<compile_context>
chip_gen: v6e
topology: v6e:2x2x1
jax: 0.10.0
libtpu: 0.0.40
codegen_flags: <defaults>
</compile_context>

<pallas_src>
import jax
import jax.numpy as jnp
from jax.experimental import pallas as pl
from jax.experimental.pallas import tpu as pltpu


def _equiv_linear_kernel(x_ref, w_ref, o_ref):
    # x_ref: [TM, F_in*3]   (TM node rows, flattened feature*component axis)
    # w_ref: [F_in*3, F_out*3]  (Kronecker-expanded weight, resident in VMEM)
    # o_ref: [TM, F_out*3]
    o_ref[...] = jnp.dot(
        x_ref[...], w_ref[...], preferred_element_type=jnp.float32
    ).astype(o_ref.dtype)


def equivariant_linear(x, w, *, tm=1024):
    """x: [N, F_in, 3], w: [F_out, F_in]  ->  [N, F_out, 3]"""
    N, F_in, D = x.shape
    F_out = w.shape[0]

    K = F_in * D          # contraction width inside the kernel
    NO = F_out * D        # output lane width

    # Free (bitcast-style) view: no HBM transpose, unlike swapaxes.
    x2 = x.reshape(N, K)

    # Kronecker-expanded weight, built once from the tiny [F_out, F_in] matrix:
    # Wk[fi*D + di, fo*D + do] = W[fo, fi] * (di == do)
    wk = jnp.kron(jnp.transpose(w), jnp.eye(D, dtype=w.dtype))   # [F_in*D, F_out*D]

    # Row tile: as large as possible (>=512 ideally); if N is small, one full block.
    tm_eff = N if N <= tm else tm
    grid = (pl.cdiv(N, tm_eff),)

    itemsize = jnp.dtype(x.dtype).itemsize
    cost = pl.CostEstimate(
        flops=2 * N * K * NO,
        transcendentals=0,
        bytes_accessed=(N * K + K * NO + N * NO) * itemsize,
    )

    out2 = pl.pallas_call(
        _equiv_linear_kernel,
        out_shape=jax.ShapeDtypeStruct((N, NO), x.dtype),
        grid=grid,
        in_specs=[
            pl.BlockSpec((tm_eff, K), lambda i: (i, 0)),   # x rows, pipelined
            pl.BlockSpec((K, NO), lambda i: (0, 0)),       # weight stays resident
        ],
        out_specs=pl.BlockSpec((tm_eff, NO), lambda i: (i, 0)),
        compiler_params=pltpu.CompilerParams(
            dimension_semantics=("parallel",),             # shard over TCs on v7x
            vmem_limit_bytes=32 << 20,                     # safe on v5e/v6e/v7x
        ),
        cost_estimate=cost,
    )(x2, wk)

    # Free view back to [N, F_out, 3].
    return out2.reshape(N, F_out, D)


if __name__ == "__main__":
    # Small shapes consistent with PaiNN equivariant features: [nodes, features, 3]
    N, F_in, F_out, D = 8, 32, 64, 3

    key = jax.random.PRNGKey(0)
    kx, kw = jax.random.split(key)

    x = jax.random.normal(kx, (N, F_in, D), dtype=jnp.float32)
    # Deterministic init mimicking nn.Linear default (uniform, fan_in scaling).
    bound = 1.0 / jnp.sqrt(jnp.float32(F_in))
    w = jax.random.uniform(
        kw, (F_out, F_in), dtype=jnp.float32, minval=-bound, maxval=bound
    )

    out = equivariant_linear(x, w)
    out = jax.block_until_ready(out)

    # Reference check (plain JAX) of the exact PyTorch semantics.
    ref = jnp.einsum("nid,oi->nod", x, w)
    assert out.shape == (N, F_out, D), out.shape
    assert jnp.allclose(out, ref, atol=1e-5, rtol=1e-5)

    print("KERNEL_OK")
</pallas_src>

<mosaic_0001>
module attributes {stable_mosaic.version = 11 : i64} {
  func.func @_equiv_linear_kernel(%arg0: i32, %arg1: memref<8x96xf32, #tpu.memory_space<vmem>>, %arg2: memref<96x192xf32, #tpu.memory_space<vmem>>, %arg3: memref<8x192xf32, #tpu.memory_space<vmem>>) attributes {dimension_semantics = [#tpu.dimension_semantics<parallel>], iteration_bounds = array<i64: 1>, scalar_prefetch = 0 : i64, scratch_operands = 0 : i64, tpu.core_type = #tpu.core_type<tc>, window_params = [{transform_indices = @transform_0, window_bounds = array<i64: 8, 96>}, {pipeline_mode = #tpu.pipeline_mode<synchronous>, transform_indices = @transform_1, window_bounds = array<i64: 96, 192>}, {transform_indices = @transform_2, window_bounds = array<i64: 8, 192>}]} {
    %c0 = arith.constant 0 : index
    %c0_0 = arith.constant 0 : index
    %0 = vector.load %arg1[%c0, %c0_0] : memref<8x96xf32, #tpu.memory_space<vmem>>, vector<8x96xf32>
    %c0_1 = arith.constant 0 : index
    %c0_2 = arith.constant 0 : index
    %1 = vector.load %arg2[%c0_1, %c0_2] : memref<96x192xf32, #tpu.memory_space<vmem>>, vector<96x192xf32>
    %cst = arith.constant dense<0.000000e+00> : vector<8x192xf32>
    %2 = tpu.matmul %0, %1, %cst {dimension_numbers = #tpu.dot_dimension_numbers<[1], [0], [0], [1], [0, 0, 1, 1], [], []>} : vector<8x96xf32>, vector<96x192xf32>, vector<8x192xf32> -> vector<8x192xf32>
    %c0_3 = arith.constant 0 : index
    %c0_4 = arith.constant 0 : index
    %3 = vector.load %arg3[%c0_3, %c0_4] : memref<8x192xf32, #tpu.memory_space<vmem>>, vector<8x192xf32>
    tpu.vector_store %arg3[%c0_3, %c0_4], %2 {strides = array<i32>} : memref<8x192xf32, #tpu.memory_space<vmem>>, vector<8x192xf32>,
    return
  }
  func.func @transform_0(%arg0: i32) -> (i32, i32) {
    %c0_i32 = arith.constant 0 : i32
    %c0_i32_0 = arith.constant 0 : i32
    return %arg0, %c0_i32 : i32, i32
  }
  func.func @transform_1(%arg0: i32) -> (i32, i32) {
    %c0_i32 = arith.constant 0 : i32
    %c0_i32_0 = arith.constant 0 : i32
    %c0_i32_1 = arith.constant 0 : i32
    return %c0_i32, %c0_i32_0 : i32, i32
  }
  func.func @transform_2(%arg0: i32) -> (i32, i32) {
    %c0_i32 = arith.constant 0 : i32
    %c0_i32_0 = arith.constant 0 : i32
    return %arg0, %c0_i32 : i32, i32
  }
}

</mosaic_0001>

<bundles_post_ra>
// kernel: tpu_custom_call.1
= control target key start
LH: loop header
LB: loop body
LE: loop exit
PB: predicated region body
PF: predicated region fallthrough
CT: control target
= control target key end

     0   :  { %7 = vsyncpa [#allocation3], 0  ;;  %s260_s0 = inlined_call_operand.hbm [shape: f32[8,96], index: 0, kind: input, shape index: {}]   ;;  %s261_s1 = inlined_call_operand.hbm [shape: f32[96,192], index: 1, kind: input, shape index: {}]   ;;  %s262_s2 = inlined_call_operand.hbm [shape: f32[8,192], index: 2, kind: output, shape index: {}]  }
   0x1   :  { %8 = vsyncpa [#allocation6], 0 }
   0x2   :  { %9 = vsyncpa [#allocation4], 0  ;;  %s230_s9 = smov [#allocation2]   ;;  %s231_s11 = smov [#allocation5]  }
   0x3   :  { %s16_s10 = sshll.u32 %s230_s9, 4  ;;  %s25_s12 = sshll.u32 %s231_s11, 4  ;;  %s17_s10 = int_to_ptr.vmem [resolvable:$true] %s16_s10  ;;  %s26_s12 = int_to_ptr.vmem [resolvable:$true] %s25_s12 }
   0x4   :  { %s172_s13 = scalar_lea.vmem %s17_s10, 128  ;;  %p177_p1 = scmp.lt.s32.totalorder %s17_s10, %s17_s10 }
   0x5   :  { %p173_p0 = scmp.ne.s32.totalorder %s17_s10, %s172_s13  ;;  %p178_p2 = scmp.lt.s32.totalorder %s172_s13, %s172_s13 }
   0x7   :  { %p179_p3 = por %p178_p2, %p177_p1 }
   0x9   :  { %p180_p4 = pnand %p179_p3, %p173_p0 }
   0xb   :  { %183 = shalt.err (!%p180_p4)
}
   0xc   :  { %19 = dma.hbm_to_vmem [thread:$0]  %s260_s0, 128, %s17_s10, [#allocation3]  }
   0xd   :  { %s192_s16 = scalar_lea.vmem %s26_s12, 3072  ;;  %p197_p6 = scmp.lt.s32.totalorder %s26_s12, %s26_s12 }
   0xe   :  { %p193_p5 = scmp.ne.s32.totalorder %s26_s12, %s192_s16  ;;  %p198_p7 = scmp.lt.s32.totalorder %s192_s16, %s192_s16 }
  0x10   :  { %p199_p8 = por %p198_p7, %p197_p6 }
  0x12   :  { %p200_p9 = pnand %p199_p8, %p193_p5 }
  0x14   :  { %203 = shalt.err (!%p200_p9)
}
  0x15   :  { %s232_s17 = smov 256   ;;  %s233_s18 = smov 16  }
  0x16   :  { %31 = dma.hbm_to_vmem [thread:$0]  %s261_s1, 3072, %s26_s12, [#allocation6], %s232_s17, %s232_s17, %s233_s18  }
  0x17   :  { %224 = dma.done.wait [#allocation3], 128  }
  0x18   :  { %225 = vsyncadd [#allocation3], 4294967168 }
  0x19   :  { %226 = dma.done.wait [#allocation6], 3072  }
  0x1a   :  { %227 = vsyncadd [#allocation6], 4294964224  ;;  %v234_v0 = vmov 0.0   ;;  %v62_v1 = vld [vmem:[#allocation5 + $0xb8] sm:$0xff]  ;;  %v61_v2 = vld [vmem:[#allocation5 + $0xb0] sm:$0xff]  ;;  %vm63_vm0 = vcmask 785408  }
  0x1b   :  { %131 = vmatprep.mubr.f32.mxu0 %v234_v0  ;;  %v60_v3 = vld [vmem:[#allocation5 + $0xa8] sm:$0xff]  ;;  %75 = vmatprep.subr.mxu0 %v62_v1  ;;  %v59_v4 = vld [vmem:[#allocation5 + $0xa0] sm:$0xff]  ;;  %v58_v5 = vld [vmem:[#allocation5 + $0x98] sm:$0xff]  ;;  %s235_s0 = smov [#allocation7]   ;;  %vm139_vm1 = vcmask 523264  }
  0x1c   :  { %76 = vmatpush1.msra.mxu0 %v61_v2  ;;  %v57_v6 = vld [vmem:[#allocation5 + $0x90] sm:$0xff]  ;;  %v56_v7 = vld [vmem:[#allocation5 + $0x88] sm:$0xff]  ;;  %v55_v8 = vld [vmem:[#allocation5 + $0x80] sm:$0xff]  ;;  %s147_s1 = sshll.u32 %s235_s0, 4  ;;  %s148_s1 = int_to_ptr.vmem [resolvable:$true] %s147_s1 }
  0x1d   :  { %77 = vmatprep.subr.mxu0 %v60_v3  ;;  %v54_v9 = vld [vmem:[#allocation5 + $0x78] sm:$0xff]  ;;  %v53_v10 = vld [vmem:[#allocation5 + $0x70] sm:$0xff]  ;;  %v52_v11 = vld [vmem:[#allocation5 + $0x68] sm:$0xff]  ;;  %s204_s21 = scalar_lea.vmem %s148_s1, 256  ;;  %p209_p11 = scmp.lt.s32.totalorder %s148_s1, %s148_s1 }
  0x1e   :  { %78 = vmatpush1.msra.mxu0 %v59_v4  ;;  %v51_v12 = vld [vmem:[#allocation5 + $0x60] sm:$0xff]  ;;  %v50_v13 = vld [vmem:[#allocation5 + $0x58] sm:$0xff]  ;;  %v49_v14 = vld [vmem:[#allocation5 + $0x50] sm:$0xff]  ;;  %p205_p10 = scmp.ne.s32.totalorder %s148_s1, %s204_s21  ;;  %p210_p12 = scmp.lt.s32.totalorder %s204_s21, %s204_s21 }
  0x1f   :  { %79 = vmatprep.subr.mxu0 %v58_v5  ;;  %v48_v15 = vld [vmem:[#allocation5 + $0x48] sm:$0xff]  ;;  %v47_v16 = vld [vmem:[#allocation5 + $0x40] sm:$0xff]  ;;  %v46_v17 = vld [vmem:[#allocation5 + $0x38] sm:$0xff] }
  0x20   :  { %80 = vmatpush1.msra.mxu0 %v57_v6  ;;  %v45_v18 = vld [vmem:[#allocation5 + $0x30] sm:$0xff]  ;;  %v44_v19 = vld [vmem:[#allocation5 + $0x28] sm:$0xff]  ;;  %v43_v20 = vld [vmem:[#allocation5 + $0x20] sm:$0xff]  ;;  %p211_p13 = por %p210_p12, %p209_p11 }
  0x21   :  { %81 = vmatprep.subr.mxu0 %v56_v7  ;;  %v42_v21 = vld [vmem:[#allocation5 + $0x18] sm:$0xff]  ;;  %v41_v22 = vld [vmem:[#allocation5 + $0x10] sm:$0xff]  ;;  %v40_v23 = vld [vmem:[#allocation5 + $0x8] sm:$0xff] }
  0x22   :  { %82 = vmatpush1.msra.mxu0 %v55_v8  ;;  %v39_v24 = vld [vmem:[#allocation5] sm:$0xff]  ;;  %v38_v25 = vld [vmem:[#allocation2] sm:$0xff]  ;;  %p212_p0 = pnand %p211_p13, %p205_p10 }
  0x23   :  { %83 = vmatprep.subr.mxu0 %v54_v9 }
  0x24   :  { %84 = vmatpush1.msra.mxu0 %v53_v10 }
  0x25   :  { %85 = vmatprep.subr.mxu0 %v52_v11 }
  0x26   :  { %86 = vmatpush1.msra.mxu0 %v51_v12 }
  0x27   :  { %87 = vmatprep.subr.mxu0 %v50_v13 }
  0x28   :  { %88 = vmatpush1.msra.mxu0 %v49_v14 }
  0x29   :  { %89 = vmatprep.subr.mxu0 %v48_v15 }
  0x2a   :  { %90 = vmatpush1.msra.mxu0 %v47_v16 }
  0x2b   :  { %91 = vmatprep.subr.mxu0 %v46_v17 }
  0x2c   :  { %92 = vmatpush1.msra.mxu0 %v45_v18 }
  0x2d   :  { %93 = vmatprep.subr.mxu0 %v44_v19 }
  0x2e   :  { %94 = vmatpush1.msra.mxu0 %v43_v20 }
  0x2f   :  { %95 = vmatprep.subr.mxu0 %v42_v21 }
  0x30   :  { %96 = vmatpush1.msra.mxu0 %v41_v22 }
  0x31   :  { %97 = vmatprep.subr.mxu0 %v40_v23 }
  0x32   :  { %98 = vmatpush1.msra.mxu0 %v39_v24 }
  0x33   :  { %157 = vmatmul.mubr.msk.f32.vlgmr.msra.gmra.mxu0 %vm63_vm0, %v38_v25 }
  0xf3   :  { %v133_v26 = vpop.f32.mrf.mxu0 }
  0xf4   :  { %138 = vst [vmem:[#allocation7] sm:$0xff] %v133_v26 }
  0xf5   :  { %v135_v27 = vpop.f32.mrf.mxu0 }
  0xf6   :  { %140 = vst.msk [vmem:[#allocation7 + $0x8] sm:$0xff] %vm139_vm1, %v135_v27 }
  0xf7   :  { %215 = shalt.err (!%p212_p0)
}
  0xf8   :  { %150 = dma.vmem_to_hbm [thread:$0]  %s148_s1, 256, %s262_s2, [#allocation4]  }
  0xf9   :  { %228 = dma.done.wait [#allocation4], 256  }
  0xfa   :  { %229 = vsyncadd [#allocation4], 4294967040 }
  0xfb   :  { %154 = vsyncpa [#allocation3], 1 }
  0xfc   :  { %155 = vsyncpa [#allocation6], 1 }
  0xfd   :  { %156 = vsyncpa [#allocation4], 1 }

</bundles_post_ra>
